<compile_context>
chip_gen: v7x
topology: tpu7x:2x2x1
jax: 0.10.0
libtpu: 0.0.40
codegen_flags: <defaults>
</compile_context>

<pallas_src>
import functools

import jax
import jax.numpy as jnp
from jax.experimental import pallas as pl
from jax.experimental.pallas import tpu as pltpu


def _round_up(n, m):
    return ((n + m - 1) // m) * m


# ----------------------------------------------------------------------------
# Fused Pallas kernel: conv(KxK) + bias + ReLU + GAP -> fc -> all task heads.
# One grid step == one batch element (grid axis is "parallel" -> v7x megacore).
# ----------------------------------------------------------------------------
def _lll_forward_kernel(patches_ref, convw_ref, convb_ref,
                        fcw_ref, fcb_ref, headw_ref,
                        feats_ref, logits_ref, *, inv_hw):
    """Blocks seen by one grid step (b = batch element):

    patches: (1, Cin*K*K, H*W)    bf16  im2col column block, spatial dim on lanes
    convw:   (Cout, Cin*K*K)      bf16  conv weight = LHS of the flipped matmul
    convb:   (Cout, 1)            f32
    fcw:     (Cout, FEAT_PAD)     f32   fc weight pre-transposed to (In, Out)
    fcb:     (1, FEAT_PAD)        f32
    headw:   (FEAT_PAD, HEAD_PAD) f32   all heads stacked, (In, Out), zero-padded
    feats:   (1, 1, FEAT_PAD)     f32 out
    logits:  (1, 1, HEAD_PAD)     f32 out
    """
    xb = patches_ref[0]                                        # (CKK, HW) bf16

    # Conv2d as one MXU matmul with the wide spatial dim on lanes.
    y = jnp.dot(convw_ref[...], xb,
                preferred_element_type=jnp.float32)            # (Cout, HW) f32
    y = jnp.maximum(y + convb_ref[...], 0.0)                   # bias (sublane bcast) + ReLU

    # Global average pool: one lane reduction; 1/(H*W) folded into the tiny column.
    pooled = jnp.sum(y, axis=1, keepdims=True) * inv_hw        # (Cout, 1) f32

    # Shared fc layer.  Cout << 128 lanes, so an MXU pass would be mostly empty:
    # do it as a lane-broadcast multiply + sublane reduction on the VPU/XLU.
    feats = jnp.sum(pooled * fcw_ref[...], axis=0, keepdims=True) + fcb_ref[...]
    feats_ref[0] = feats                                       # (1, FEAT_PAD) f32

    # Every bias-free task head fused into one lane-dense MXU matmul.
    logits_ref[0] = jnp.dot(feats, headw_ref[...],
                            preferred_element_type=jnp.float32)  # (1, HEAD_PAD)


# ----------------------------------------------------------------------------
# Jitted wrapper: im2col + single pallas_call (weights arrive pre-packed).
# ----------------------------------------------------------------------------
@functools.partial(jax.jit, static_argnames=("out_size", "head_sizes"))
def _lll_forward(x, convw, convb, fcw, fcb, headw, *, out_size, head_sizes):
    """x: (B, Cin, H, W) NCHW.  Packed weights are cached class state."""
    B, Cin, H, W = x.shape
    Cout, CKK = convw.shape
    K = int(round((CKK // Cin) ** 0.5))
    HW = H * W
    FEAT_PAD = fcw.shape[1]
    HEAD_PAD = headw.shape[1]

    # im2col -> (B, Cin*K*K, H*W): contraction dim on sublanes, spatial dim
    # lane-dense; built with pad + static slices + stack + reshape (no 5-D
    # transpose).  bf16 halves the HBM traffic of the only sizeable operand.
    # TODO(synk): for large B or H*W, move im2col into the kernel (DMA the
    # padded input once and build the K*K shifted views with static slices /
    # pltpu.roll) to avoid the K*K-fold HBM inflation, and batch-tile the grid
    # (e.g. 8 elements / step) to amortize per-step overhead; re-derive tiles
    # against v7x's 64 MiB VMEM.
    pad = K // 2
    xp = jnp.pad(x, ((0, 0), (0, 0), (pad, pad), (pad, pad)))
    cols = [xp[:, :, ky:ky + H, kx:kx + W] for ky in range(K) for kx in range(K)]
    patches = jnp.stack(cols, axis=2)                          # (B, Cin, K*K, H, W)
    patches = patches.reshape(B, Cin * K * K, HW).astype(jnp.bfloat16)

    kernel = functools.partial(_lll_forward_kernel, inv_hw=1.0 / HW)

    flops = 2 * B * (Cout * CKK * HW + Cout * FEAT_PAD + FEAT_PAD * HEAD_PAD)
    bytes_accessed = (patches.size * 2 + convw.size * 2
                      + 4 * (convb.size + fcw.size + fcb.size + headw.size)
                      + 4 * B * (FEAT_PAD + HEAD_PAD))

    feats_p, logits_p = pl.pallas_call(
        kernel,
        out_shape=(jax.ShapeDtypeStruct((B, 1, FEAT_PAD), jnp.float32),
                   jax.ShapeDtypeStruct((B, 1, HEAD_PAD), jnp.float32)),
        grid=(B,),
        in_specs=[
            pl.BlockSpec((1, CKK, HW), lambda b: (b, 0, 0)),        # patches
            pl.BlockSpec((Cout, CKK), lambda b: (0, 0)),            # conv weight
            pl.BlockSpec((Cout, 1), lambda b: (0, 0)),              # conv bias
            pl.BlockSpec((Cout, FEAT_PAD), lambda b: (0, 0)),       # fc weight
            pl.BlockSpec((1, FEAT_PAD), lambda b: (0, 0)),          # fc bias
            pl.BlockSpec((FEAT_PAD, HEAD_PAD), lambda b: (0, 0)),   # all heads
        ],
        out_specs=(
            pl.BlockSpec((1, 1, FEAT_PAD), lambda b: (b, 0, 0)),
            pl.BlockSpec((1, 1, HEAD_PAD), lambda b: (b, 0, 0)),
        ),
        compiler_params=pltpu.CompilerParams(
            dimension_semantics=("parallel",)),
        cost_estimate=pl.CostEstimate(flops=flops, transcendentals=0,
                                      bytes_accessed=bytes_accessed),
    )(patches, convw, convb, fcw, fcb, headw)

    feats = feats_p[:, 0, :out_size]
    logits = logits_p[:, 0, :]
    ys, off = [], 0
    for n in head_sizes:
        ys.append(logits[:, off:off + n])
        off += n
    return ys, feats


# ----------------------------------------------------------------------------
# LLL_Net in JAX (forward semantics of the PyTorch module)
# ----------------------------------------------------------------------------
class LLLNetPallas:
    """Backbone (Conv3x3 -> ReLU -> GAP -> Linear 'fc') + bias-free task heads.

    Mirrors LLL_Net with head_var == 'fc', remove_existing_head=False
    (so out_size == fc.out_features).  Heads are nn.Linear(out_size, n, bias=False).
    """

    def __init__(self, key, in_ch=4, conv_out=8, out_size=32):
        k1, k2, k3, k4 = jax.random.split(key, 4)
        self.conv_w = 0.1 * jax.random.normal(k1, (conv_out, in_ch, 3, 3), jnp.float32)
        self.conv_b = 0.1 * jax.random.normal(k2, (conv_out,), jnp.float32)
        self.fc_w = 0.1 * jax.random.normal(k3, (out_size, conv_out), jnp.float32)
        self.fc_b = 0.1 * jax.random.normal(k4, (out_size,), jnp.float32)
        self.out_size = out_size
        self.heads = []
        self.task_cls = []
        self.task_offset = []

        # ---- one-time weight packing (cached; never rebuilt per forward) ----
        self._feat_pad = _round_up(out_size, 128)
        self._convw_p = self.conv_w.reshape(conv_out, -1).astype(jnp.bfloat16)
        self._convb_p = self.conv_b.reshape(conv_out, 1).astype(jnp.float32)
        self._fcw_p = (jnp.zeros((conv_out, self._feat_pad), jnp.float32)
                       .at[:, :out_size].set(self.fc_w.T))          # (In, Out)
        self._fcb_p = (jnp.zeros((1, self._feat_pad), jnp.float32)
                       .at[:, :out_size].set(self.fc_b))
        self._headw_p = None
        # TODO(synk): get_copy/set_state_dict/freeze_all/freeze_backbone/freeze_bn
        # are training-time utilities with no forward-pass compute; not translated.

    def add_head(self, key, num_outputs):
        w = 0.1 * jax.random.normal(key, (num_outputs, self.out_size), jnp.float32)
        self.heads.append(w)
        self.task_cls = [h.shape[0] for h in self.heads]
        offsets = [0]
        for c in self.task_cls[:-1]:
            offsets.append(offsets[-1] + c)
        self.task_offset = offsets
        # Re-pack all heads once, here (outside the forward path): stacked,
        # transposed to (In, Out) and zero-padded to 128-lane width.
        total = sum(self.task_cls)
        head_pad = _round_up(total, 128)
        heads_cat = jnp.concatenate(self.heads, axis=0)               # (total, out_size)
        self._headw_p = (jnp.zeros((self._feat_pad, head_pad), jnp.float32)
                         .at[:self.out_size, :total].set(heads_cat.T))

    def forward(self, x, return_features=False):
        assert len(self.heads) > 0, "Cannot access any head"
        ys, feats = _lll_forward(
            x, self._convw_p, self._convb_p, self._fcw_p, self._fcb_p,
            self._headw_p, out_size=self.out_size,
            head_sizes=tuple(self.task_cls))
        if return_features:
            return ys, feats
        return ys


# ----------------------------------------------------------------------------
# reference (pure JAX, f32) for validation
# ----------------------------------------------------------------------------
def _reference_forward(net, x):
    y = jax.lax.conv_general_dilated(
        x, net.conv_w, window_strides=(1, 1), padding=((1, 1), (1, 1)),
        dimension_numbers=("NCHW", "OIHW", "NCHW"))
    y = jnp.maximum(y + net.conv_b[None, :, None, None], 0.0)
    feats = jnp.mean(y, axis=(2, 3))
    feats = feats @ net.fc_w.T + net.fc_b
    return [feats @ h_w.T for h_w in net.heads], feats


if __name__ == "__main__":
    key = jax.random.PRNGKey(0)
    k_x, k_net, k_h0, k_h1 = jax.random.split(key, 4)

    B, C, H, W = 2, 4, 16, 16
    x = jax.random.normal(k_x, (B, C, H, W), jnp.float32)

    net = LLLNetPallas(k_net, in_ch=C, conv_out=8, out_size=32)
    net.add_head(k_h0, 5)     # task 0: 5 classes
    net.add_head(k_h1, 7)     # task 1: 7 classes

    ys, feats = net.forward(x, return_features=True)
    ys = [jax.block_until_ready(y) for y in ys]
    feats = jax.block_until_ready(feats)

    ref_ys, ref_feats = _reference_forward(net, x)
    assert len(ys) == 2 and ys[0].shape == (B, 5) and ys[1].shape == (B, 7)
    assert feats.shape == (B, 32)
    # conv operands are bf16 (f32 accumulation); fc/heads are pure f32.
    for y, ry in zip(ys + [feats], ref_ys + [ref_feats]):
        err = float(jnp.max(jnp.abs(y - ry)))
        assert jnp.allclose(y, ry, atol=2e-2, rtol=2e-2), f"mismatch: max abs err {err}"

    print("KERNEL_OK")
</pallas_src>

<mosaic_0001>
module attributes {stable_mosaic.version = 11 : i64} {
  func.func @_lll_forward_kernel(%arg0: i32, %arg1: memref<1x36x256xbf16, #tpu.memory_space<vmem>>, %arg2: memref<8x36xbf16, #tpu.memory_space<vmem>>, %arg3: memref<8x1xf32, #tpu.memory_space<vmem>>, %arg4: memref<8x128xf32, #tpu.memory_space<vmem>>, %arg5: memref<1x128xf32, #tpu.memory_space<vmem>>, %arg6: memref<128x128xf32, #tpu.memory_space<vmem>>, %arg7: memref<1x1x128xf32, #tpu.memory_space<vmem>>, %arg8: memref<1x1x128xf32, #tpu.memory_space<vmem>>) attributes {dimension_semantics = [#tpu.dimension_semantics<parallel>], iteration_bounds = array<i64: 2>, scalar_prefetch = 0 : i64, scratch_operands = 0 : i64, tpu.core_type = #tpu.core_type<tc>, window_params = [{transform_indices = @transform_0, window_bounds = array<i64: 1, 36, 256>}, {pipeline_mode = #tpu.pipeline_mode<synchronous>, transform_indices = @transform_1, window_bounds = array<i64: 8, 36>}, {pipeline_mode = #tpu.pipeline_mode<synchronous>, transform_indices = @transform_2, window_bounds = array<i64: 8, 1>}, {pipeline_mode = #tpu.pipeline_mode<synchronous>, transform_indices = @transform_3, window_bounds = array<i64: 8, 128>}, {pipeline_mode = #tpu.pipeline_mode<synchronous>, transform_indices = @transform_4, window_bounds = array<i64: 1, 128>}, {pipeline_mode = #tpu.pipeline_mode<synchronous>, transform_indices = @transform_5, window_bounds = array<i64: 128, 128>}, {transform_indices = @transform_6, window_bounds = array<i64: 1, 1, 128>}, {transform_indices = @transform_7, window_bounds = array<i64: 1, 1, 128>}]} {
    %c0 = arith.constant 0 : index
    %c0_0 = arith.constant 0 : index
    %c0_1 = arith.constant 0 : index
    %0 = vector.load %arg1[%c0, %c0_0, %c0_1] : memref<1x36x256xbf16, #tpu.memory_space<vmem>>, vector<1x36x256xbf16>
    %1 = vector.shape_cast %0 : vector<1x36x256xbf16> to vector<36x256xbf16>
    %c0_2 = arith.constant 0 : index
    %c0_3 = arith.constant 0 : index
    %2 = vector.load %arg2[%c0_2, %c0_3] : memref<8x36xbf16, #tpu.memory_space<vmem>>, vector<8x36xbf16>
    %cst = arith.constant dense<0.000000e+00> : vector<8x256xf32>
    %3 = tpu.matmul %2, %1, %cst {dimension_numbers = #tpu.dot_dimension_numbers<[1], [0], [0], [1], [0, 0, 1, 1], [], []>} : vector<8x36xbf16>, vector<36x256xbf16>, vector<8x256xf32> -> vector<8x256xf32>
    %c0_4 = arith.constant 0 : index
    %c0_5 = arith.constant 0 : index
    %4 = vector.load %arg3[%c0_4, %c0_5] : memref<8x1xf32, #tpu.memory_space<vmem>>, vector<8x1xf32>
    %5 = vector.broadcast %4 : vector<8x1xf32> to vector<8x256xf32>
    %6 = arith.addf %3, %5 : vector<8x256xf32>
    %cst_6 = arith.constant 0.000000e+00 : f32
    %7 = vector.broadcast %cst_6 : f32 to vector<8x256xf32>
    %8 = arith.maximumf %6, %7 : vector<8x256xf32>
    %cst_7 = arith.constant dense<0.000000e+00> : vector<8xf32>
    %9 = vector.multi_reduction <add>, %8, %cst_7 [1] : vector<8x256xf32> to vector<8xf32>
    %10 = vector.shape_cast %9 : vector<8xf32> to vector<8x1xf32>
    %cst_8 = arith.constant 3.906250e-03 : f32
    %11 = vector.broadcast %cst_8 : f32 to vector<8x1xf32>
    %12 = arith.mulf %10, %11 : vector<8x1xf32>
    %c0_9 = arith.constant 0 : index
    %c0_10 = arith.constant 0 : index
    %13 = vector.load %arg4[%c0_9, %c0_10] : memref<8x128xf32, #tpu.memory_space<vmem>>, vector<8x128xf32>
    %14 = vector.broadcast %12 : vector<8x1xf32> to vector<8x128xf32>
    %15 = arith.mulf %14, %13 : vector<8x128xf32>
    %cst_11 = arith.constant dense<0.000000e+00> : vector<128xf32>
    %16 = vector.multi_reduction <add>, %15, %cst_11 [0] : vector<8x128xf32> to vector<128xf32>
    %17 = vector.shape_cast %16 : vector<128xf32> to vector<1x128xf32>
    %c0_12 = arith.constant 0 : index
    %c0_13 = arith.constant 0 : index
    %18 = vector.load %arg5[%c0_12, %c0_13] : memref<1x128xf32, #tpu.memory_space<vmem>>, vector<1x128xf32>
    %19 = arith.addf %17, %18 : vector<1x128xf32>
    %c0_14 = arith.constant 0 : index
    %c0_15 = arith.constant 0 : index
    %c0_16 = arith.constant 0 : index
    %20 = vector.load %arg7[%c0_14, %c0_15, %c0_16] : memref<1x1x128xf32, #tpu.memory_space<vmem>>, vector<1x1x128xf32>
    %21 = vector.shape_cast %20 : vector<1x1x128xf32> to vector<1x128xf32>
    %22 = vector.shape_cast %19 : vector<1x128xf32> to vector<1x1x128xf32>
    tpu.vector_store %arg7[%c0_14, %c0_15, %c0_16], %22 {strides = array<i32>} : memref<1x1x128xf32, #tpu.memory_space<vmem>>, vector<1x1x128xf32>,
    %c0_17 = arith.constant 0 : index
    %c0_18 = arith.constant 0 : index
    %23 = vector.load %arg6[%c0_17, %c0_18] : memref<128x128xf32, #tpu.memory_space<vmem>>, vector<128x128xf32>
    %cst_19 = arith.constant dense<0.000000e+00> : vector<1x128xf32>
    %24 = tpu.matmul %19, %23, %cst_19 {dimension_numbers = #tpu.dot_dimension_numbers<[1], [0], [0], [1], [0, 0, 1, 1], [], []>} : vector<1x128xf32>, vector<128x128xf32>, vector<1x128xf32> -> vector<1x128xf32>
    %c0_20 = arith.constant 0 : index
    %c0_21 = arith.constant 0 : index
    %c0_22 = arith.constant 0 : index
    %25 = vector.load %arg8[%c0_20, %c0_21, %c0_22] : memref<1x1x128xf32, #tpu.memory_space<vmem>>, vector<1x1x128xf32>
    %26 = vector.shape_cast %25 : vector<1x1x128xf32> to vector<1x128xf32>
    %27 = vector.shape_cast %24 : vector<1x128xf32> to vector<1x1x128xf32>
    tpu.vector_store %arg8[%c0_20, %c0_21, %c0_22], %27 {strides = array<i32>} : memref<1x1x128xf32, #tpu.memory_space<vmem>>, vector<1x1x128xf32>,
    return
  }
  func.func @transform_0(%arg0: i32) -> (i32, i32, i32) {
    %c0_i32 = arith.constant 0 : i32
    %c0_i32_0 = arith.constant 0 : i32
    %c0_i32_1 = arith.constant 0 : i32
    return %arg0, %c0_i32, %c0_i32_0 : i32, i32, i32
  }
  func.func @transform_1(%arg0: i32) -> (i32, i32) {
    %c0_i32 = arith.constant 0 : i32
    %c0_i32_0 = arith.constant 0 : i32
    %c0_i32_1 = arith.constant 0 : i32
    return %c0_i32, %c0_i32_0 : i32, i32
  }
  func.func @transform_2(%arg0: i32) -> (i32, i32) {
    %c0_i32 = arith.constant 0 : i32
    %c0_i32_0 = arith.constant 0 : i32
    %c0_i32_1 = arith.constant 0 : i32
    return %c0_i32, %c0_i32_0 : i32, i32
  }
  func.func @transform_3(%arg0: i32) -> (i32, i32) {
    %c0_i32 = arith.constant 0 : i32
    %c0_i32_0 = arith.constant 0 : i32
    %c0_i32_1 = arith.constant 0 : i32
    return %c0_i32, %c0_i32_0 : i32, i32
  }
  func.func @transform_4(%arg0: i32) -> (i32, i32) {
    %c0_i32 = arith.constant 0 : i32
    %c0_i32_0 = arith.constant 0 : i32
    %c0_i32_1 = arith.constant 0 : i32
    return %c0_i32, %c0_i32_0 : i32, i32
  }
  func.func @transform_5(%arg0: i32) -> (i32, i32) {
    %c0_i32 = arith.constant 0 : i32
    %c0_i32_0 = arith.constant 0 : i32
    %c0_i32_1 = arith.constant 0 : i32
    return %c0_i32, %c0_i32_0 : i32, i32
  }
  func.func @transform_6(%arg0: i32) -> (i32, i32, i32) {
    %c0_i32 = arith.constant 0 : i32
    %c0_i32_0 = arith.constant 0 : i32
    %c0_i32_1 = arith.constant 0 : i32
    return %arg0, %c0_i32, %c0_i32_0 : i32, i32, i32
  }
  func.func @transform_7(%arg0: i32) -> (i32, i32, i32) {
    %c0_i32 = arith.constant 0 : i32
    %c0_i32_0 = arith.constant 0 : i32
    %c0_i32_1 = arith.constant 0 : i32
    return %arg0, %c0_i32, %c0_i32_0 : i32, i32, i32
  }
}

</mosaic_0001>

<bundles_post_ra>
// kernel: _lll_forward.1
= control target key start
LH: loop header
LB: loop body
LE: loop exit
PB: predicated region body
PF: predicated region fallthrough
CT: control target
= control target key end

     0   :  { %13 = vsyncpa [#allocation3], 0  ;;  %s987_s0 = inlined_call_operand.vmem [shape: bf16[2,36,256], index: 0, kind: input, shape index: {}]   ;;  %s988_s1 = inlined_call_operand.vmem [shape: bf16[8,36], index: 1, kind: input, shape index: {}]   ;;  %s989_s2 = inlined_call_operand.vmem [shape: f32[8,1], index: 2, kind: input, shape index: {}]   ;;  %s990_s3 = inlined_call_operand.vmem [shape: f32[8,128], index: 3, kind: input, shape index: {}]   ;;  %s991_s4 = inlined_call_operand.vmem [shape: f32[1,128], index: 4, kind: input, shape index: {}]   ;;  %s992_s5 = inlined_call_operand.vmem [shape: f32[128,128], index: 5, kind: input, shape index: {}]   ;;  %s993_s6 = inlined_call_operand.hbm [shape: f32[2,1,128], index: 6, kind: output, shape index: {0}]   ;;  %s994_s7 = inlined_call_operand.vmem [shape: f32[2,1,128], index: 7, kind: output, shape index: {1}]  }
   0x1   :  { %15 = vsyncpa [#allocation3 + $0x1], 0  ;;  %s826_s24 = smov 0   ;;  %s828_s25 = smov 0  }
   0x2   :  { %s830_s26 = smov 0   ;;  %s832_s27 = smov 0  }
   0x3 LB: > { %s847_s28 = sadd.s32 4294967295, %s779_s27   ;;  %s572_s29 = sadd.s32 4294967294, %s779_s27   ;;  %s779_s27 = sphi %s832_s27, %s1000_s27   ;;  %s775_s26 = sphi %s830_s26, %s999_s26   ;;  %s771_s25 = sphi %s828_s25, %s998_s25   ;;  %s767_s24 = sphi %s826_s24, %s997_s24  }
   0x4   : > { %s851_s30 = sadd.s32 1, %s779_s27   ;;  %s159_s8 = sadd.s32 1, %s775_s26 }
   0x5   : > { %s156_s9 = ssub.s32 %s779_s27, %s851_s30  ;;  %p169_p0 = scmp.ne.s32.totalorder %s775_s26, %s771_s25 }
   0x6   : > { %p157_p1 = scmp.eq.s32.totalorder %s156_s9, 0  ;;  %p170_p2 = scmp.eq.s32.totalorder %s847_s28, 1 }
   0x7   : > { %p175_p3 = scmp.ne.s32.totalorder %s771_s25, %s767_s24  ;;  %p176_p4 = scmp.eq.s32.totalorder %s572_s29, 1 }
   0x8   : > { %s862_s10 = scalar_select %p157_p1, %s775_s26, %s159_s8  }
   0x9   : > { %p864_p5 = por %p170_p2, %p169_p0  ;;  %p868_p6 = por %p176_p4, %p175_p3 }
   0xa   : > { %p575_p7 = scmp.ge.s32.totalorder %s779_s27, 1  ;;  %p243_p8 = scmp.lt.s32.totalorder %s779_s27, 3 }
   0xc   : > { %p244_p9 = pnand %p575_p7, %p243_p8 }
   0xd   : > { %p277_p10 = scmp.lt.s32.totalorder (!%p244_p9), %s847_s28, 1  ;;  %v781_v0 = vmov (!%p244_p9), 0   ;;  %v292_v1 = vld [vmem:[%s989_s2] sm:$0xff] (!%p244_p9)  ;;  %vm327_vm0 = vcmask (!%p244_p9), 1041408   ;;  %vm323_vm1 = vcmask (!%p244_p9), 293888   ;;  %v393_v12 = vld [vmem:[%s992_s5 + $0x8] sm:$0xff] (!%p244_p9) }
   0xe   : > { %247 = sbr.rel (%p244_p9) target bundleno = 631 (0x277), region = 44  ;;  %366 = vmatprep.mubr.bf16.mxu0 (!%p244_p9), %v781_v0  ;;  %708 = vset.pattern.permute.xlu0 (!%p244_p9), %v781_v0  ;;  %v291_v10 = vld [vmem:[%s988_s1] sm:$0xf] (!%p244_p9)  ;;  %v394_v13 = vld [vmem:[%s992_s5 + $0x10] sm:$0xff] (!%p244_p9)  ;;  %v782_v14 = vmov (!%p244_p9), 0.0|0.0   ;;  %v395_v16 = vld [vmem:[%s992_s5 + $0x18] sm:$0xff] (!%p244_p9) }
   0xf   : > { %295 = vperm.xlu0 (!%p244_p9), %708, %v292_v1   ;;  %v392_v11 = vld [vmem:[%s992_s5] sm:$0xff] (!%p244_p9)  ;;  %640 = vmatprep.subr.bf16.mxu1 (!%p244_p9), %v782_v14  ;;  %v644_v17 = vpack.c.bf16 (!%p244_p9), %v395_v16, %v394_v13  ;;  %v397_v19 = vld [vmem:[%s992_s5 + $0x28] sm:$0xff] (!%p244_p9)  ;;  %v398_v21 = vld [vmem:[%s992_s5 + $0x30] sm:$0xff] (!%p244_p9)  ;;  %vm783_vm2 = vmmov (!%p244_p9), 0   ;;  %v784_v46 = vmov (!%p244_p9), 0.0   ;;  %s270_s17 = sand.u32 (!%p244_p9), 1, %s771_s25  }
  0x10   : > { %v641_v15 = vpack.c.bf16 (!%p244_p9), %v393_v12, %v392_v11  ;;  %v396_v18 = vld [vmem:[%s992_s5 + $0x20] sm:$0xff] (!%p244_p9)  ;;  %v399_v22 = vld [vmem:[%s992_s5 + $0x38] sm:$0xff] (!%p244_p9)  ;;  %v401_v35 = vld [vmem:[%s992_s5 + $0x48] sm:$0xff] (!%p244_p9)  ;;  %637 = vmatprep.mubr.msk.f32.mxu1 (!%p244_p9), %vm783_vm2, %v784_v46  ;;  %s271_s20 = scalar_lea.vmem (!%p244_p9), [#allocation2], %s270_s17  ;;  %s585_s21 = sshll.u32 (!%p244_p9), %s847_s28, 4 }
  0x11   : > { %v647_v20 = vpack.c.bf16 (!%p244_p9), %v397_v19, %v396_v18  ;;  %v650_v23 = vpack.c.bf16 (!%p244_p9), %v399_v22, %v398_v21  ;;  %v400_v34 = vld [vmem:[%s992_s5 + $0x40] sm:$0xff] (!%p244_p9)  ;;  %v402_v37 = vld [vmem:[%s992_s5 + $0x50] sm:$0xff] (!%p244_p9)  ;;  %v403_v38 = vld [vmem:[%s992_s5 + $0x58] sm:$0xff] (!%p244_p9)  ;;  %s495_s22 = sshll.u32 (!%p244_p9), %s271_s20, 4  ;;  %s947_s8 = scalar_lea.hbm (!%p244_p9), %s993_s6, %s585_s21  ;;  %s496_s22 = int_to_ptr.vmem [resolvable:$true] %s495_s22 }
  0x12   : > { %642 = vmatpush3.bf16.msra.mxu1 (!%p244_p9), %v641_v15  ;;  %v653_v36 = vpack.c.bf16 (!%p244_p9), %v401_v35, %v400_v34  ;;  %v656_v39 = vpack.c.bf16 (!%p244_p9), %v403_v38, %v402_v37  ;;  %v404_v40 = vld [vmem:[%s992_s5 + $0x60] sm:$0xff] (!%p244_p9)  ;;  %v405_v41 = vld [vmem:[%s992_s5 + $0x68] sm:$0xff] (!%p244_p9)  ;;  %v406_v43 = vld [vmem:[%s992_s5 + $0x70] sm:$0xff] (!%p244_p9)  ;;  %s480_s9 = scalar_lea.sflag (!%p244_p9), [#allocation3], %s270_s17  ;;  %s717_s13 = scalar_lea.vmem (!%p244_p9), %s496_s22, 16 }
  0x13   : > { %643 = vmatprep.subr.bf16.mxu1 (!%p244_p9), %v782_v14  ;;  %v659_v42 = vpack.c.bf16 (!%p244_p9), %v405_v41, %v404_v40  ;;  %v407_v44 = vld [vmem:[%s992_s5 + $0x78] sm:$0xff] (!%p244_p9)  ;;  %v381_v47 = vld [vmem:[%s990_s3] sm:$0xff] (!%p244_p9)  ;;  %p718_p11 = scmp.ne.s32.totalorder (!%p244_p9), %s496_s22, %s717_s13  ;;  %s785_s14 = smov (!%p244_p9), [#allocation2]  }
  0x14   : > { %v662_v45 = vpack.c.bf16 (!%p244_p9), %v407_v44, %v406_v43  ;;  %v389_v56 = vld [vmem:[%s991_s4] sm:$0x1] (!%p244_p9) }
  0x15   : > { %s879_s15 = scalar_select %p277_p10, %s847_s28, 1 }
  0x16   : > { %645 = vmatpush3.bf16.msra.mxu1 %v644_v17  ;;  %p719_p12 = pnand %p718_p11, %p864_p5 }
  0x17   : > { %s664_s16 = smul.u32 40, %s879_s15  ;;  %646 = vmatprep.subr.bf16.mxu1 %v782_v14 }
  0x18   : > { %p720_p13 = pneg %p719_p12 }
  0x19   : > { %s281_s19 = scalar_lea.vmem %s987_s0, %s664_s16  ;;  %s721_s16 = sshll.u32 %s785_s14, 4  ;;  %s722_s16 = int_to_ptr.vmem [resolvable:$false] %s721_s16 }
  0x1a   : > { %v709_v2 = vld [vmem:[%s281_s19 + $0x4] ss:$8 sps:$4 sm:$0xff]   ;;  %v711_v3 = vld [vmem:[%s281_s19] ss:$8 sps:$4 sm:$0xff]   ;;  %v712_v4 = vld [vmem:[%s281_s19 + $0x14] ss:$8 sps:$4 sm:$0xff]   ;;  %648 = vmatpush3.bf16.msra.mxu1 %v647_v20  ;;  %p724_p0 = scmp.lt.s32.totalorder %s496_s22, %s722_s16 }
  0x1b   : > { %334 = vmatprep.subr.bf16.mxu0 %v709_v2  ;;  %v290_v5 = vld [vmem:[%s281_s19 + $0x20] sm:$0x33]  ;;  %v714_v6 = vld [vmem:[%s281_s19 + $0x10] ss:$8 sps:$4 sm:$0xff]   ;;  %649 = vmatprep.subr.bf16.mxu1 %v782_v14  ;;  %s723_s18 = scalar_lea.vmem %s722_s16, 32 }
  0x1c   : > { %335 = vmatpush1.bf16.msra.mxu0 %v711_v3  ;;  %v582_v7 = vcombine.high %v290_v5, %v290_v5  ;;  %v581_v8 = vcombine.low %v290_v5, %v290_v5  ;;  %p725_p1 = scmp.lt.s32.totalorder %s723_s18, %s717_s13 }
  0x1d   : > { %336 = vmatprep.subr.bf16.mxu0 %v712_v4 }
  0x1e   : > { %v329_v9 = vsel %vm327_vm0, %v581_v8, 0  ;;  %651 = vmatpush3.bf16.msra.mxu1 %v650_v23  ;;  %p726_p2 = por %p725_p1, %p724_p0 }
  0x1f   : > { %652 = vmatprep.subr.bf16.mxu1 %v782_v14 }
  0x20   : > { %337 = vmatpush1.bf16.msra.mxu0 %v714_v6  ;;  %p727_p3 = pnand %p726_p2, %p720_p13 }
  0x21   : > { %583 = vmatprep.subr.msk.bf16.mxu0 %vm327_vm0, %v582_v7 }
  0x22   : > { %654 = vmatpush3.bf16.msra.mxu1 %v653_v36 }
  0x23   : > { %655 = vmatprep.subr.bf16.mxu1 %v782_v14 }
  0x24   : > { %339 = vmatpush1.bf16.msra.mxu0 %v329_v9 }
  0x26   : > { %657 = vmatpush3.bf16.msra.mxu1 %v656_v39 }
  0x27   : > { %584 = vmatmul.mubr.msk.bf16.vlgmr.msra.gmra.mrb[0].mxu0 %vm323_vm1, %v291_v10  ;;  %658 = vmatprep.subr.bf16.mxu1 %v782_v14 }
  0x2a   : > { %660 = vmatpush3.bf16.msra.mxu1 %v659_v42 }
  0x2b   : > { %661 = vmatprep.subr.bf16.mxu1 %v782_v14 }
  0x2e   : > { %663 = vmatpush3.bf16.msra.mxu1 %v662_v45 }
  0x8e   : > { %v296_v24 = vpop.permute.xlu0 %295 }
  0xfa   : > { %v368_v25 = vpop.f32.mrb[0].mxu0 }
  0xfb   : > { %v369_v26 = vadd.f32 %v368_v25, %v296_v24  ;;  %v370_v27 = vpop.f32.mrb[1].mxu0 }
  0xfc   : > { %v371_v28 = vadd.f32 %v370_v27, %v296_v24  ;;  %v372_v29 = vpop.f32.mrb[2].mxu0 }
  0xfd   : > { %v375_v30 = vmax.f32 %v369_v26, 0.0  ;;  %v373_v31 = vpop.f32.mrb[3].mxu0 }
  0xfe   : > { %v376_v32 = vmax.f32 %v371_v28, 0.0 }
 0x100   : > { %v377_v33 = vadd.f32 %v376_v32, %v375_v30 }
 0x102   : > { %378 = vadd.xlane.f32.xlu0 %v377_v33 }
 0x18f   : > { %v379_v48 = vpop.xlane.xlu0 %378 }
 0x190   : > { %v380_v49 = vmul.f32 0.00390625, %v379_v48 }
 0x192   : > { %v382_v50 = vmul.f32 %v381_v47, %v380_v49 }
 0x194   : > { %v383_v51 = vrot.slane %v382_v50, 4 }
 0x196   : > { %v384_v52 = vadd.f32 %v383_v51, %v382_v50 }
 0x198   : > { %v385_v53 = vrot.slane %v384_v52, 2 }
 0x19a   : > { %v386_v54 = vadd.f32 %v385_v53, %v384_v52 }
 0x19c   : > { %v387_v55 = vrot.slane %v386_v54, 1 }
 0x19e   : > { %v388_v57 = vadd.f32 %v387_v55, %v386_v54 }
 0x1a0   : > { %v390_v58 = vadd.f32 %v389_v56, %v388_v57 }
 0x1a2   : > { %638 = vmatmul.mubr.f32.vlgmr.msra.gmra.mrb[0].mxu1 %v390_v58  ;;  %391 = vst [vmem:[%s271_s20] sm:$0x1] %v390_v58 }
 0x1a3   : > { %730 = shalt.err (!%p727_p3)
}
 0x1a4   : > { %s731_s28 = scalar_lea.hbm %s947_s8, 16  ;;  %s735_s20 = scalar_lea.hbm %s993_s6, 32 }
 0x1a5   : > { %p732_p4 = scmp.ne.s32.totalorder %s947_s8, %s731_s28  ;;  %p736_p9 = scmp.lt.u32.totalorder %s947_s8, %s993_s6 }
 0x1a6   : > { %p737_p10 = scmp.lt.u32.totalorder %s735_s20, %s731_s28  ;;  %p739_p12 = scmp.lt.u32.totalorder %s731_s28, %s947_s8 }
 0x1a7   : > { %p733_p7 = pnand %p732_p4, %p864_p5 }
 0x1a8   : > { %p738_p11 = por %p737_p10, %p736_p9 }
 0x1a9   : > { %p734_p8 = pneg %p733_p7 }
 0x1aa   : > { %p740_p13 = por %p739_p12, %p738_p11 }
 0x1ac   : > { %p741_p0 = pnand %p740_p13, %p734_p8 }
 0x1ae   : > { %744 = shalt.err (!%p741_p0)
}
 0x1af   : > { %665 = dma.vmem_to_hbm [thread:$0]  (%p864_p5), %s496_s22, 16, %s947_s8, %s480_s9  }
 0x1b0   : > { %s284_s14 = scalar_lea.vmem %s994_s7, %s879_s15 }
 0x275   : > { %v474_v59 = vpop.f32.mrb[0].mxu1 }
 0x276   : > { %478 = vst [vmem:[%s284_s14] sm:$0x1] %v474_v59  ;;  %v639_v60 = vpop.f32.mrb[1].mxu1 }
 0x277 PF: > { %p671_p1 = scmp.ge.s32.totalorder %s779_s27, 2  ;;  %s510_s16 = sand.u32 1, %s767_s24  }
 0x278   : > { %s511_s18 = scalar_lea.sflag [#allocation3], %s510_s16 }
 0x279   : > { %p668_p2 = pnand %p671_p1, %p868_p6 }
 0x27b   : > { %762 = dma.done.wait (!%p668_p2), %s511_s18, 16  }
 0x27c   : > { %764 = vsyncadd (!%p668_p2), %s511_s18, 4294967280  ;;  %p18_p5 = scmp.ge.s32.totalorder %s851_s30, 4   ;;  %s997_s24 = smov %s771_s25 }
 0x27d   : > { %s998_s25 = smov %s775_s26  ;;  %s999_s26 = smov %s862_s10 }
 0x27e   : > { %s1000_s27 = smov %s851_s30  ;;  %20 = sbr.rel (!%p18_p5) target bundleno = 3 (0x3), region = 91 }
 0x285   :  { %521 = vsyncpa [#allocation3], 1 }
 0x286   :  { %523 = vsyncpa [#allocation3 + $0x1], 1 }

</bundles_post_ra>
